<compile_context>
chip_gen: v6e
topology: v6e:2x2x1
jax: 0.10.0
libtpu: 0.0.40
codegen_flags: <defaults>
</compile_context>

<pallas_src>
import functools

import jax
import jax.numpy as jnp
from jax.experimental import pallas as pl
from jax.experimental.pallas import tpu as pltpu


def _clamp_kernel(x_ref, o_ref, *, min_val, max_val):
    # torch.clamp(torch.clamp(x, min=min), max=max) == clip to [min, max]
    x = x_ref[...]
    lo = jnp.asarray(min_val, dtype=x.dtype)
    hi = jnp.asarray(max_val, dtype=x.dtype)
    o_ref[...] = jnp.minimum(jnp.maximum(x, lo), hi)


_TARGET_BLOCK_BYTES = 4 * 1024 * 1024  # ~4 MiB / buffer; x2 buffers x (in+out) ~= 16 MiB VMEM
_VMEM_LIMIT_BYTES = 32 * 1024 * 1024   # safe on v5e/v6e (128 MiB) and v7x (64 MiB)


def _sublane_multiple(dtype):
    # Packed sub-32-bit dtypes need 16 (bf16/f16) or 32 (int8/fp8) sublanes.
    itemsize = jnp.dtype(dtype).itemsize
    return max(8, 32 // max(itemsize, 1))


def _pick_cols(n):
    # Largest lane-dense width that evenly divides the element count.
    for cand in (4096, 2048, 1024, 512, 256, 128):
        if n % cand == 0:
            return cand
    return None


def _clamp_2d(x2d, min_val, max_val):
    rows, cols = x2d.shape
    dtype = x2d.dtype
    itemsize = jnp.dtype(dtype).itemsize
    sub = _sublane_multiple(dtype)

    # Dtype-aware, VMEM-sized block rows (multiple of the sublane pack).
    target_rows = max(sub, (_TARGET_BLOCK_BYTES // (cols * itemsize)) // sub * sub)
    block_rows = rows if rows <= target_rows else target_rows

    grid = (pl.cdiv(rows, block_rows),)
    kernel = functools.partial(_clamp_kernel, min_val=min_val, max_val=max_val)

    return pl.pallas_call(
        kernel,
        out_shape=jax.ShapeDtypeStruct((rows, cols), dtype),
        grid_spec=pltpu.PrefetchScalarGridSpec(
            num_scalar_prefetch=0,
            grid=grid,
            in_specs=[pl.BlockSpec((block_rows, cols), lambda i: (i, 0))],
            out_specs=pl.BlockSpec((block_rows, cols), lambda i: (i, 0)),
        ),
        compiler_params=pltpu.CompilerParams(
            dimension_semantics=("parallel",),   # shards across both TCs on v7x
            vmem_limit_bytes=_VMEM_LIMIT_BYTES,
        ),
    )(x2d)


def clamp_pallas(x, min_val=0.0, max_val=1.0):
    """Elementwise clamp of `x` to [min_val, max_val] via a Pallas TPU kernel."""
    orig_shape = x.shape
    n = int(x.size)
    if n == 0:
        return x

    flat = x.reshape(-1)  # row-major reshape: layout-preserving, no copy

    cols = _pick_cols(n)
    if cols is not None:
        # Fast path: no padding, no extra HBM traffic.
        out2d = _clamp_2d(flat.reshape(n // cols, cols), min_val, max_val)
        return out2d.reshape(orig_shape)

    # Fallback: element count not a multiple of 128 lanes -> pad only the tail.
    cols = 512
    padded_n = -(-n // cols) * cols
    flat_p = jnp.pad(flat, (0, padded_n - n))
    out2d = _clamp_2d(flat_p.reshape(padded_n // cols, cols), min_val, max_val)
    return out2d.reshape(-1)[:n].reshape(orig_shape)


class ClampModule:
    """JAX/Pallas equivalent of the PyTorch Clamp module."""

    def __init__(self, min=0, max=1):
        self.min = float(min)
        self.max = float(max)

    def __call__(self, x):
        return clamp_pallas(x, self.min, self.max)


if __name__ == "__main__":
    key = jax.random.PRNGKey(0)
    module = ClampModule(min=0, max=1)

    # NCHW input consistent with typical usage of this module.
    x = jax.random.normal(key, (2, 4, 16, 16), dtype=jnp.float32) * 2.0
    out = jax.block_until_ready(module(x))
    ref = jnp.minimum(jnp.maximum(x, 0.0), 1.0)
    assert out.shape == x.shape and out.dtype == x.dtype
    assert jnp.allclose(out, ref), "Mismatch vs reference clamp (f32, aligned)"

    # Non-128-multiple size exercises the tail-pad fallback path.
    x_odd = jax.random.normal(jax.random.PRNGKey(1), (3, 5, 7), dtype=jnp.float32) * 2.0
    out_odd = jax.block_until_ready(module(x_odd))
    ref_odd = jnp.minimum(jnp.maximum(x_odd, 0.0), 1.0)
    assert out_odd.shape == x_odd.shape
    assert jnp.allclose(out_odd, ref_odd), "Mismatch vs reference clamp (odd shape)"

    # bf16 exercises the dtype-aware sublane tiling.
    x_bf = x.astype(jnp.bfloat16)
    out_bf = jax.block_until_ready(module(x_bf))
    ref_bf = jnp.minimum(jnp.maximum(x_bf, jnp.bfloat16(0.0)), jnp.bfloat16(1.0))
    assert out_bf.dtype == jnp.bfloat16
    assert jnp.allclose(out_bf.astype(jnp.float32), ref_bf.astype(jnp.float32)), \
        "Mismatch vs reference clamp (bf16)"

    print("KERNEL_OK")
</pallas_src>

<mosaic_0001>
module attributes {stable_mosaic.version = 11 : i64} {
  func.func @_clamp_kernel(%arg0: i32, %arg1: memref<1x2048xf32, #tpu.memory_space<vmem>>, %arg2: memref<1x2048xf32, #tpu.memory_space<vmem>>) attributes {dimension_semantics = [#tpu.dimension_semantics<parallel>], iteration_bounds = array<i64: 1>, scalar_prefetch = 0 : i64, scratch_operands = 0 : i64, tpu.core_type = #tpu.core_type<tc>, window_params = [{transform_indices = @transform_0, window_bounds = array<i64: 1, 2048>}, {transform_indices = @transform_1, window_bounds = array<i64: 1, 2048>}]} {
    %c0 = arith.constant 0 : index
    %c0_0 = arith.constant 0 : index
    %0 = vector.load %arg1[%c0, %c0_0] : memref<1x2048xf32, #tpu.memory_space<vmem>>, vector<1x2048xf32>
    %cst = arith.constant 0.000000e+00 : f32
    %1 = vector.broadcast %cst : f32 to vector<1x2048xf32>
    %2 = arith.maximumf %0, %1 : vector<1x2048xf32>
    %cst_1 = arith.constant 1.000000e+00 : f32
    %3 = vector.broadcast %cst_1 : f32 to vector<1x2048xf32>
    %4 = arith.minimumf %2, %3 : vector<1x2048xf32>
    %c0_2 = arith.constant 0 : index
    %c0_3 = arith.constant 0 : index
    %5 = vector.load %arg2[%c0_2, %c0_3] : memref<1x2048xf32, #tpu.memory_space<vmem>>, vector<1x2048xf32>
    tpu.vector_store %arg2[%c0_2, %c0_3], %4 {strides = array<i32>} : memref<1x2048xf32, #tpu.memory_space<vmem>>, vector<1x2048xf32>,
    return
  }
  func.func @transform_0(%arg0: i32) -> (i32, i32) {
    %c0_i32 = arith.constant 0 : i32
    %c0_i32_0 = arith.constant 0 : i32
    return %arg0, %c0_i32 : i32, i32
  }
  func.func @transform_1(%arg0: i32) -> (i32, i32) {
    %c0_i32 = arith.constant 0 : i32
    %c0_i32_0 = arith.constant 0 : i32
    return %arg0, %c0_i32 : i32, i32
  }
}

</mosaic_0001>

<bundles_post_ra>
// kernel: tpu_custom_call.1
= control target key start
LH: loop header
LB: loop body
LE: loop exit
PB: predicated region body
PF: predicated region fallthrough
CT: control target
= control target key end

     0   :  { %6 = vsyncpa [#allocation3], 0  ;;  %s108_s0 = inlined_call_operand.hbm [shape: f32[1,2048], index: 0, kind: input, shape index: {}]   ;;  %s109_s1 = inlined_call_operand.hbm [shape: f32[1,2048], index: 1, kind: output, shape index: {}]  }
   0x1   :  { %7 = vsyncpa [#allocation4], 0  ;;  %s90_s6 = smov [#allocation2]  }
   0x2   :  { %s14_s7 = sshll.u32 %s90_s6, 4  ;;  %s15_s7 = int_to_ptr.vmem [resolvable:$true] %s14_s7 }
   0x3   :  { %s54_s8 = scalar_lea.vmem %s15_s7, 256  ;;  %p59_p1 = scmp.lt.s32.totalorder %s15_s7, %s15_s7 }
   0x4   :  { %p55_p0 = scmp.ne.s32.totalorder %s15_s7, %s54_s8  ;;  %p60_p2 = scmp.lt.s32.totalorder %s54_s8, %s54_s8 }
   0x6   :  { %p61_p3 = por %p60_p2, %p59_p1 }
   0x8   :  { %p62_p4 = pnand %p61_p3, %p55_p0 }
   0xa   :  { %65 = shalt.err (!%p62_p4)
}
   0xb   :  { %17 = dma.hbm_to_vmem [thread:$0]  %s108_s0, 256, %s15_s7, [#allocation3]  }
   0xc   :  { %86 = dma.done.wait [#allocation3], 256  }
   0xd   :  { %87 = vsyncadd [#allocation3], 4294967040  ;;  %v21_v0 = vld [vmem:[#allocation2] sm:$0xff]  ;;  %v22_v1 = vld [vmem:[#allocation2 + $0x8] sm:$0xff]  ;;  %s91_s11 = smov [#allocation5]  }
   0xe   :  { %s35_s12 = sshll.u32 %s91_s11, 4  ;;  %v23_v2 = vmax.f32 %v21_v0, 0.0  ;;  %v24_v3 = vmax.f32 %v22_v1, 0.0  ;;  %s36_s12 = int_to_ptr.vmem [resolvable:$true] %s35_s12 }
   0xf   :  { %s66_s13 = scalar_lea.vmem %s36_s12, 256  ;;  %p71_p6 = scmp.lt.s32.totalorder %s36_s12, %s36_s12 }
  0x10   :  { %v25_v4 = vmin.f32 %v23_v2, 1.0  ;;  %v26_v5 = vmin.f32 %v24_v3, 1.0  ;;  %p67_p5 = scmp.ne.s32.totalorder %s36_s12, %s66_s13  ;;  %p72_p7 = scmp.lt.s32.totalorder %s66_s13, %s66_s13 }
  0x12   :  { %27 = vst [vmem:[#allocation5] sm:$0xff] %v25_v4  ;;  %28 = vst [vmem:[#allocation5 + $0x8] sm:$0xff] %v26_v5  ;;  %p73_p8 = por %p72_p7, %p71_p6 }
  0x14   :  { %p74_p9 = pnand %p73_p8, %p67_p5 }
  0x16   :  { %77 = shalt.err (!%p74_p9)
}
  0x17   :  { %38 = dma.vmem_to_hbm [thread:$0]  %s36_s12, 256, %s109_s1, [#allocation4]  }
  0x18   :  { %88 = dma.done.wait [#allocation4], 256  }
  0x19   :  { %89 = vsyncadd [#allocation4], 4294967040 }
  0x1a   :  { %42 = vsyncpa [#allocation3], 1 }
  0x1b   :  { %43 = vsyncpa [#allocation4], 1 }

</bundles_post_ra>
